<compile_context>
chip_gen: v6e
topology: v6e:2x2x1
jax: 0.10.0
libtpu: 0.0.40
codegen_flags: <defaults>
</compile_context>

<pallas_src>
import math

import jax
import jax.numpy as jnp
from jax.experimental import pallas as pl
from jax.experimental.pallas import tpu as pltpu


def _prefix_sum(prefix_refs, dim):
    """Row-major sum over all axial tables except the last.

    prefix[r, d] = sum_k axial_k[i_k, d], r = row-major(i_1 .. i_{K-1}).
    Computed in f32. NB: the in-kernel reshape is layout-free only when every
    merged axial length (k >= 1) is a multiple of 8; otherwise still correct,
    just pays a small relayout per merge.
    """
    prefix = prefix_refs[0][...].astype(jnp.float32)
    rows = prefix_refs[0].shape[0]
    for k in range(1, len(prefix_refs)):
        a_k = prefix_refs[k][...].astype(jnp.float32)
        lk = a_k.shape[0]
        prefix = (prefix[:, None, :] + a_k[None, :, :]).reshape(rows * lk, dim)
        rows *= lk
    return prefix


def _make_lane_dense_kernel(num_prefix, last_len, dim):
    """dim < 128 path: write one lane-dense (rows, last_len*dim) slab so the
    epilogue is a full-width unmasked store (matters most on v5e)."""

    def kernel(*refs):
        prefix_refs = refs[:num_prefix]           # each (L_k or t0, dim)
        last_ref = refs[num_prefix]               # (1, last_len * dim)
        out_ref = refs[num_prefix + 1]            # (rows_block, last_len * dim)
        prefix = _prefix_sum(prefix_refs, dim)
        tiled = jnp.tile(prefix, (1, last_len))   # (rows_block, last_len * dim)
        out_ref[...] = (tiled + last_ref[...].astype(jnp.float32)).astype(out_ref.dtype)

    return kernel


def _make_natural_kernel(num_prefix, dim):
    """dim % 128 == 0 path: natural layout is already lane-dense, plain
    broadcast add over a 3-D (rows, last_len, dim) block."""

    def kernel(*refs):
        prefix_refs = refs[:num_prefix]           # each (L_k or t0, dim)
        last_ref = refs[num_prefix]               # (last_len, dim)
        out_ref = refs[num_prefix + 1]            # (rows_block, last_len, dim)
        prefix = _prefix_sum(prefix_refs, dim)
        last = last_ref[...].astype(jnp.float32)
        out_ref[...] = (prefix[:, None, :] + last[None, :, :]).astype(out_ref.dtype)

    return kernel


def _choose_first_axis_block(L0, rows_per_first, out_bytes_per_first, natural,
                             target_block_bytes=2 << 20):
    """Largest divisor of L0 whose output block stays under target bytes while
    respecting the (8, 128) block rules for the axial_0 input block and, on
    the lane-dense path, the 2-D output block."""
    valid = []
    for t in range(1, L0 + 1):
        if L0 % t:
            continue
        if t != L0 and t % 8 != 0:                      # axial_0 input sublane rule
            continue
        if (not natural) and t != L0 and (t * rows_per_first) % 8 != 0:
            continue                                    # lane-dense output sublane rule
        valid.append(t)
    fitting = [t for t in valid if t * out_bytes_per_first <= target_block_bytes]
    return max(fitting) if fitting else min(valid)


def axial_positional_embedding(axials, *, flatten=True, first_axis_block=None):
    """axials: list of (axial_len, dim) arrays (already filtered to len > 1)."""
    num_axials = len(axials)
    dim = int(axials[0].shape[1])
    lens = [int(a.shape[0]) for a in axials]
    dtype = axials[0].dtype
    itemsize = jnp.dtype(dtype).itemsize

    if num_axials == 1:
        # positions == axial1; identical whether flattened or not.
        return axials[0]

    prefix_lens = lens[:-1]
    last_len = lens[-1]
    prefix_rows = math.prod(prefix_lens)
    total_rows = prefix_rows * last_len
    num_prefix = len(prefix_lens)

    natural = (dim % 128 == 0)
    L0 = prefix_lens[0]
    rows_per_first = prefix_rows // L0
    out_bytes_per_first = rows_per_first * last_len * dim * itemsize

    if first_axis_block is None:
        t0 = _choose_first_axis_block(L0, rows_per_first, out_bytes_per_first, natural)
    else:
        t0 = int(first_axis_block)
        assert L0 % t0 == 0, "first_axis_block must divide the first axial length"

    # HBM-writeback bound once overhead is removed; tell XLA what this costs.
    cost = pl.CostEstimate(
        flops=(num_axials - 1) * total_rows * dim,
        transcendentals=0,
        bytes_accessed=(total_rows + sum(lens)) * dim * itemsize,
    )

    if natural:
        last_in = axials[-1]                                  # (last_len, dim)
        out_shape = jax.ShapeDtypeStruct((prefix_rows, last_len, dim), dtype)
        kernel = _make_natural_kernel(num_prefix, dim)
    else:
        # Lane-dense presentation of the last axial: (L, dim) -> (1, L*dim) is a
        # metadata-only reshape of a contiguous row-major array.
        last_in = axials[-1].reshape(1, last_len * dim)
        out_shape = jax.ShapeDtypeStruct((prefix_rows, last_len * dim), dtype)
        kernel = _make_lane_dense_kernel(num_prefix, last_len, dim)

    kernel_inputs = list(axials[:-1]) + [last_in]

    if t0 == L0:
        # Whole table comfortably fits VMEM: grid-less call, whole-array VMEM
        # blocks -- no pipeline scaffolding, no double-buffered output slab.
        vmem = pl.BlockSpec(memory_space=pltpu.MemorySpace.VMEM)
        out = pl.pallas_call(
            kernel,
            out_shape=out_shape,
            in_specs=[vmem] * len(kernel_inputs),
            out_specs=vmem,
            cost_estimate=cost,
        )(*kernel_inputs)
    else:
        # Real grid over the first axial axis: writeback pipelines behind
        # compute, "parallel" axis shards across v7x's two TensorCores, block
        # bytes stay well under v7x's 64 MiB VMEM (32 MiB default scoped).
        grid = (L0 // t0,)
        rb = t0 * rows_per_first
        in_specs = [pl.BlockSpec((t0, dim), lambda i: (i, 0))]
        for k in range(1, num_prefix):
            in_specs.append(pl.BlockSpec((prefix_lens[k], dim), lambda i: (0, 0)))
        if natural:
            in_specs.append(pl.BlockSpec((last_len, dim), lambda i: (0, 0)))
            out_spec = pl.BlockSpec((rb, last_len, dim), lambda i: (i, 0, 0))
        else:
            in_specs.append(pl.BlockSpec((1, last_len * dim), lambda i: (0, 0)))
            out_spec = pl.BlockSpec((rb, last_len * dim), lambda i: (i, 0))
        out = pl.pallas_call(
            kernel,
            out_shape=out_shape,
            grid=grid,
            in_specs=in_specs,
            out_specs=out_spec,
            compiler_params=pltpu.CompilerParams(
                dimension_semantics=("parallel",)),
            cost_estimate=cost,
        )(*kernel_inputs)

    # Both output layouts share the flattened row-major order -> metadata-only
    # reshape to the PyTorch-equivalent table.
    pos = out.reshape(total_rows, dim)
    if flatten:
        return pos
    return pos.reshape(tuple(lens) + (dim,))


def ref_forward(axials, flatten=True):
    """Pure-JAX reference mirroring the PyTorch forward."""
    positions = None
    for a in axials:
        positions = a if positions is None else positions[..., None, :] + a
    if flatten:
        positions = positions.reshape(-1, positions.shape[-1])
    return positions


if __name__ == "__main__":
    key = jax.random.PRNGKey(0)

    def make_axials(k, shape, dim, dtype=jnp.float32):
        keys = jax.random.split(k, len(shape))
        return [jax.random.normal(kk, (l, dim), dtype=dtype)
                for kk, l in zip(keys, shape)]

    # 1) Module config (small): dim=32, shape=(1, 4, 8, 8) -> filtered (4, 8, 8).
    #    Whole table fits VMEM -> grid-less lane-dense path (dim < 128).
    dim1 = 32
    shape1 = tuple(s for s in (1, 4, 8, 8) if s > 1)
    ax1 = make_axials(jax.random.fold_in(key, 1), shape1, dim1)
    out1 = jax.block_until_ready(axial_positional_embedding(ax1, flatten=True))
    ref1 = ref_forward(ax1, flatten=True)
    assert out1.shape == (math.prod(shape1), dim1), out1.shape
    assert jnp.allclose(out1, ref1, atol=1e-6, rtol=1e-6), "mismatch (test 1)"

    out1_nf = jax.block_until_ready(axial_positional_embedding(ax1, flatten=False))
    ref1_nf = ref_forward(ax1, flatten=False)
    assert out1_nf.shape == shape1 + (dim1,), out1_nf.shape
    assert jnp.allclose(out1_nf, ref1_nf, atol=1e-6, rtol=1e-6), "mismatch (test 1, flatten=False)"

    # 2) Gridded natural path (dim % 128 == 0), grid over the first axial axis.
    dim2 = 128
    shape2 = (16, 8, 8)
    ax2 = make_axials(jax.random.fold_in(key, 2), shape2, dim2)
    out2 = jax.block_until_ready(
        axial_positional_embedding(ax2, flatten=True, first_axis_block=8))
    ref2 = ref_forward(ax2, flatten=True)
    assert out2.shape == (math.prod(shape2), dim2), out2.shape
    assert jnp.allclose(out2, ref2, atol=1e-6, rtol=1e-6), "mismatch (test 2)"

    # 3) Gridded lane-dense path (dim < 128), grid over the first axial axis.
    dim3 = 32
    shape3 = (16, 8, 8)
    ax3 = make_axials(jax.random.fold_in(key, 3), shape3, dim3)
    out3 = jax.block_until_ready(
        axial_positional_embedding(ax3, flatten=True, first_axis_block=8))
    ref3 = ref_forward(ax3, flatten=True)
    assert out3.shape == (math.prod(shape3), dim3), out3.shape
    assert jnp.allclose(out3, ref3, atol=1e-6, rtol=1e-6), "mismatch (test 3)"

    print("KERNEL_OK")
</pallas_src>

<mosaic_0001>
module attributes {stable_mosaic.version = 11 : i64} {
  func.func @kernel(%arg0: memref<4x32xf32, #tpu.memory_space<vmem>>, %arg1: memref<8x32xf32, #tpu.memory_space<vmem>>, %arg2: memref<1x256xf32, #tpu.memory_space<vmem>>, %arg3: memref<32x256xf32, #tpu.memory_space<vmem>>) attributes {dimension_semantics = [], scalar_prefetch = 0 : i64, scratch_operands = 0 : i64, tpu.core_type = #tpu.core_type<tc>} {
    %c0 = arith.constant 0 : index
    %c0_0 = arith.constant 0 : index
    %0 = vector.load %arg0[%c0, %c0_0] : memref<4x32xf32, #tpu.memory_space<vmem>>, vector<4x32xf32>
    %c0_1 = arith.constant 0 : index
    %c0_2 = arith.constant 0 : index
    %1 = vector.load %arg1[%c0_1, %c0_2] : memref<8x32xf32, #tpu.memory_space<vmem>>, vector<8x32xf32>
    %2 = vector.shape_cast %0 : vector<4x32xf32> to vector<4x1x32xf32>
    %3 = vector.shape_cast %1 : vector<8x32xf32> to vector<1x8x32xf32>
    %4 = vector.broadcast %2 : vector<4x1x32xf32> to vector<4x8x32xf32>
    %5 = vector.broadcast %3 : vector<1x8x32xf32> to vector<4x8x32xf32>
    %6 = arith.addf %4, %5 : vector<4x8x32xf32>
    %7 = vector.shape_cast %6 : vector<4x8x32xf32> to vector<32x32xf32>
    %8 = tpu.concatenate %7, %7, %7, %7, %7, %7, %7, %7 in 1 : vector<32x32xf32>, vector<32x32xf32>, vector<32x32xf32>, vector<32x32xf32>, vector<32x32xf32>, vector<32x32xf32>, vector<32x32xf32>, vector<32x32xf32> -> vector<32x256xf32>
    %c0_3 = arith.constant 0 : index
    %c0_4 = arith.constant 0 : index
    %9 = vector.load %arg2[%c0_3, %c0_4] : memref<1x256xf32, #tpu.memory_space<vmem>>, vector<1x256xf32>
    %10 = vector.broadcast %9 : vector<1x256xf32> to vector<32x256xf32>
    %11 = arith.addf %8, %10 : vector<32x256xf32>
    %c0_5 = arith.constant 0 : index
    %c0_6 = arith.constant 0 : index
    %12 = vector.load %arg3[%c0_5, %c0_6] : memref<32x256xf32, #tpu.memory_space<vmem>>, vector<32x256xf32>
    tpu.vector_store %arg3[%c0_5, %c0_6], %11 {strides = array<i32>} : memref<32x256xf32, #tpu.memory_space<vmem>>, vector<32x256xf32>,
    return
  }
}

</mosaic_0001>

<bundles_post_ra>
// kernel: tpu_custom_call.1
= control target key start
LH: loop header
LB: loop body
LE: loop exit
PB: predicated region body
PF: predicated region fallthrough
CT: control target
= control target key end

     0   :  { %8 = vsyncpa [#allocation3], 0  ;;  %s320_s0 = inlined_call_operand.hbm [shape: f32[4,32], index: 0, kind: input, shape index: {}]   ;;  %s321_s1 = inlined_call_operand.hbm [shape: f32[8,32], index: 1, kind: input, shape index: {}]   ;;  %s322_s2 = inlined_call_operand.vmem [shape: f32[1,256], index: 2, kind: input, shape index: {}]   ;;  %s323_s3 = inlined_call_operand.hbm [shape: f32[32,256], index: 3, kind: output, shape index: {}]  }
   0x1   :  { %9 = vsyncpa [#allocation6], 0 }
   0x2   :  { %10 = vsyncpa [#allocation4], 0  ;;  %s267_s12 = smov [#allocation2]   ;;  %s268_s14 = smov [#allocation5]  }
   0x3   :  { %s17_s13 = sshll.u32 %s267_s12, 4  ;;  %s27_s15 = sshll.u32 %s268_s14, 4  ;;  %s18_s13 = int_to_ptr.vmem [resolvable:$true] %s17_s13  ;;  %s28_s15 = int_to_ptr.vmem [resolvable:$true] %s27_s15 }
   0x4   :  { %s209_s16 = scalar_lea.vmem %s18_s13, 64  ;;  %p214_p1 = scmp.lt.s32.totalorder %s18_s13, %s18_s13 }
   0x5   :  { %p210_p0 = scmp.ne.s32.totalorder %s18_s13, %s209_s16  ;;  %p215_p2 = scmp.lt.s32.totalorder %s209_s16, %s209_s16 }
   0x7   :  { %p216_p3 = por %p215_p2, %p214_p1 }
   0x9   :  { %p217_p4 = pnand %p216_p3, %p210_p0 }
   0xb   :  { %220 = shalt.err (!%p217_p4)
}
   0xc   :  { %20 = dma.hbm_to_vmem [thread:$0]  %s320_s0, 64, %s18_s13, [#allocation3]  }
   0xd   :  { %s229_s19 = scalar_lea.vmem %s28_s15, 128  ;;  %p234_p6 = scmp.lt.s32.totalorder %s28_s15, %s28_s15 }
   0xe   :  { %p230_p5 = scmp.ne.s32.totalorder %s28_s15, %s229_s19  ;;  %p235_p7 = scmp.lt.s32.totalorder %s229_s19, %s229_s19 }
  0x10   :  { %p236_p8 = por %p235_p7, %p234_p6 }
  0x12   :  { %p237_p9 = pnand %p236_p8, %p230_p5 }
  0x14   :  { %240 = shalt.err (!%p237_p9)
}
  0x15   :  { %30 = dma.hbm_to_vmem [thread:$0]  %s321_s1, 128, %s28_s15, [#allocation6]  }
  0x16   :  { %261 = dma.done.wait [#allocation3], 64  }
  0x17   :  { %262 = vsyncadd [#allocation3], 4294967232 }
  0x18   :  { %263 = dma.done.wait [#allocation6], 128  }
  0x19   :  { %264 = vsyncadd [#allocation6], 4294967168  ;;  %v53_v0 = vlaneseq  ;;  %v269_v1 = vmov 1966171168   ;;  %v40_v10 = vld [vmem:[#allocation5] sm:$0xff]  ;;  %s270_s0 = smov 32  }
  0x1a   :  { %v51_v2 = vunpack.c.l.s4 %v269_v1  ;;  %v191_v7 = vld.sshfl [vmem:[#allocation2] sm:$0x33 pattern:$0x75316420]  ;;  %s271_s1 = smov 64   ;;  %s272_s22 = smov 96  }
  0x1b   :  { %v54_v3 = vshrl.u32 %v53_v0, 7  ;;  %v49_v9 = vcombine.high %v191_v7, %v191_v7  ;;  %vm130_vm0 = vcmask 261120   ;;  %v145_v25 = vld [vmem:[%s322_s2] sm:$0x3]  ;;  %vm135_vm1 = vcmask 523264   ;;  %s273_s2 = smov [#allocation7]  }
  0x1c   :  { %v52_v4 = vunpack.c.0.s8 %v51_v2  ;;  %vm140_vm2 = vcmask 785408   ;;  %s178_s25 = sshll.u32 %s273_s2, 4  ;;  %s179_s25 = int_to_ptr.vmem [resolvable:$true] %s178_s25 }
  0x1d   :  { %v68_v6 = vsub.s32 0, %v54_v3  ;;  %v153_v24 = vsub.s32 1, %v54_v3  ;;  %s241_s26 = scalar_lea.vmem %s179_s25, 1024  ;;  %p246_p11 = scmp.lt.s32.totalorder %s179_s25, %s179_s25 }
  0x1e   :  { %v55_v5 = vsub.s32 %v52_v4, %v54_v3  ;;  %p242_p10 = scmp.ne.s32.totalorder %s179_s25, %s241_s26  ;;  %p247_p12 = scmp.lt.s32.totalorder %s241_s26, %s241_s26 }
  0x1f   :  { %v150_v29 = vrot.slane %v145_v25, %v68_v6  ;;  %v154_v30 = vrot.slane %v145_v25, %v153_v24 }
  0x20   :  { %v56_v8 = vrot.slane %v191_v7, %v55_v5  ;;  %v63_v13 = vrot.slane %v49_v9, %v55_v5  ;;  %p248_p13 = por %p247_p12, %p246_p11 }
  0x22   :  { %v69_v11 = vrot.slane %v56_v8, %v68_v6  ;;  %v64_v12 = vcombine.high %v56_v8, %v56_v8  ;;  %v73_v16 = vrot.slane %v63_v13, %v68_v6  ;;  %v65_v19 = vcombine.high %v63_v13, %v63_v13  ;;  %p249_p0 = pnand %p248_p13, %p242_p10 }
  0x24   :  { %v86_v14 = vadd.f32 %v69_v11, %v40_v10  ;;  %v77_v15 = vrot.slane %v64_v12, %v68_v6  ;;  %v87_v18 = vadd.f32 %v73_v16, %v40_v10  ;;  %v81_v20 = vrot.slane %v65_v19, %v68_v6 }
  0x26   :  { %94 = vrot.lane.b32.xlu0 %v86_v14, %s270_s0  ;;  %v88_v17 = vadd.f32 %v77_v15, %v40_v10  ;;  %v89_v21 = vadd.f32 %v81_v20, %v40_v10 }
  0x28   :  { %98 = vrot.lane.b32.xlu1 %v88_v17, %s270_s0 }
  0x2a   :  { %106 = vrot.lane.b32.xlu0 %v86_v14, %s271_s1 }
  0x2c   :  { %108 = vrot.lane.b32.xlu1 %v87_v18, %s271_s1 }
  0x2e   :  { %118 = vrot.lane.b32.xlu0 %v86_v14, %s272_s22 }
  0x30   :  { %120 = vrot.lane.b32.xlu1 %v87_v18, %s272_s22 }
  0x32   :  { %96 = vrot.lane.b32.xlu0 %v87_v18, %s270_s0 }
  0x34   :  { %100 = vrot.lane.b32.xlu1 %v89_v21, %s270_s0 }
  0x36   :  { %110 = vrot.lane.b32.xlu0 %v88_v17, %s271_s1 }
  0x38   :  { %112 = vrot.lane.b32.xlu1 %v89_v21, %s271_s1 }
  0x3a   :  { %122 = vrot.lane.b32.xlu0 %v88_v17, %s272_s22 }
  0x3c   :  { %124 = vrot.lane.b32.xlu1 %v89_v21, %s272_s22 }
  0x98   :  { %v95_v22 = vpop.permute.xlu0 %94 }
  0x99   :  { %v131_v27 = vsel %vm130_vm0, %v86_v14, %v95_v22 }
  0x9a   :  { %v99_v23 = vpop.permute.xlu1 %98 }
  0x9b   :  { %v133_v46 = vsel %vm130_vm0, %v88_v17, %v99_v23 }
  0x9c   :  { %v107_v26 = vpop.permute.xlu0 %106 }
  0x9d   :  { %v136_v31 = vsel %vm135_vm1, %v131_v27, %v107_v26 }
  0x9e   :  { %v109_v28 = vpop.permute.xlu1 %108 }
  0xa0   :  { %v119_v32 = vpop.permute.xlu0 %118 }
  0xa1   :  { %v141_v33 = vsel %vm140_vm2, %v136_v31, %v119_v32 }
  0xa2   :  { %v157_v34 = vadd.f32 %v150_v29, %v141_v33  ;;  %v158_v35 = vadd.f32 %v154_v30, %v141_v33  ;;  %v121_v36 = vpop.permute.xlu1 %120 }
  0xa4   :  { %165 = vst [vmem:[#allocation7] sm:$0xff] %v157_v34  ;;  %166 = vst [vmem:[#allocation7 + $0x8] sm:$0xff] %v158_v35  ;;  %v97_v37 = vpop.permute.xlu0 %96 }
  0xa5   :  { %v132_v38 = vsel %vm130_vm0, %v87_v18, %v97_v37 }
  0xa6   :  { %v137_v39 = vsel %vm135_vm1, %v132_v38, %v109_v28  ;;  %v101_v40 = vpop.permute.xlu1 %100 }
  0xa7   :  { %v142_v41 = vsel %vm140_vm2, %v137_v39, %v121_v36  ;;  %v134_v49 = vsel %vm130_vm0, %v89_v21, %v101_v40 }
  0xa8   :  { %v159_v42 = vadd.f32 %v150_v29, %v142_v41  ;;  %v160_v43 = vadd.f32 %v154_v30, %v142_v41  ;;  %v111_v44 = vpop.permute.xlu0 %110 }
  0xa9   :  { %v138_v47 = vsel %vm135_vm1, %v133_v46, %v111_v44 }
  0xaa   :  { %167 = vst [vmem:[#allocation7 + $0x10] sm:$0xff] %v159_v42  ;;  %168 = vst [vmem:[#allocation7 + $0x18] sm:$0xff] %v160_v43  ;;  %v113_v45 = vpop.permute.xlu1 %112 }
  0xab   :  { %v139_v51 = vsel %vm135_vm1, %v134_v49, %v113_v45 }
  0xac   :  { %v123_v48 = vpop.permute.xlu0 %122 }
  0xad   :  { %v143_v50 = vsel %vm140_vm2, %v138_v47, %v123_v48 }
  0xae   :  { %v161_v52 = vadd.f32 %v150_v29, %v143_v50  ;;  %v162_v53 = vadd.f32 %v154_v30, %v143_v50  ;;  %v125_v54 = vpop.permute.xlu1 %124 }
  0xaf   :  { %v144_v55 = vsel %vm140_vm2, %v139_v51, %v125_v54 }
  0xb0   :  { %169 = vst [vmem:[#allocation7 + $0x20] sm:$0xff] %v161_v52  ;;  %170 = vst [vmem:[#allocation7 + $0x28] sm:$0xff] %v162_v53  ;;  %v163_v56 = vadd.f32 %v150_v29, %v144_v55  ;;  %v164_v57 = vadd.f32 %v154_v30, %v144_v55 }
  0xb2   :  { %171 = vst [vmem:[#allocation7 + $0x30] sm:$0xff] %v163_v56  ;;  %172 = vst [vmem:[#allocation7 + $0x38] sm:$0xff] %v164_v57 }
  0xb3   :  { %252 = shalt.err (!%p249_p0)
}
  0xb4   :  { %s274_s27 = smov 256   ;;  %s275_s28 = smov 16  }
  0xb5   :  { %184 = dma.vmem_to_hbm [thread:$0]  %s179_s25, 1024, %s323_s3, [#allocation4], %s274_s27, %s274_s27, %s275_s28  }
  0xb6   :  { %265 = dma.done.wait [#allocation4], 1024  }
  0xb7   :  { %266 = vsyncadd [#allocation4], 4294966272 }
  0xb8   :  { %188 = vsyncpa [#allocation3], 1 }
  0xb9   :  { %189 = vsyncpa [#allocation6], 1 }
  0xba   :  { %190 = vsyncpa [#allocation4], 1 }

</bundles_post_ra>
